<compile_context>
chip_gen: v5e
topology: v5e:2x2
jax: 0.10.0
libtpu: 0.0.40
codegen_flags: <defaults>
</compile_context>

<pallas_src>
import functools

import jax
import jax.numpy as jnp
from jax.experimental import pallas as pl
from jax.experimental.pallas import tpu as pltpu

NUM_CLASSES = 14
HYPER_NCC = 10.0
HYPER_GRAD = 15.0
HYPER_DICE = 1.0

_VMEM_LIMIT = 48 * 1024 * 1024          # fits v7x (64 MiB phys), lifts v5e 16 MiB default
_NCC_BLOCK_BYTES = 1 << 20              # ~1 MiB per input per grid step (x5 inputs x2 bufs)


def _round_up(x, m):
    return (x + m - 1) // m * m


def _default_n_par():
    """Use a 2-way leading 'parallel' grid axis only where one JAX device drives
    two TensorCores (megacore v4/v5p, dual-TC v7x); single-TC parts use 1."""
    try:
        kind = jax.devices()[0].device_kind.lower()
    except Exception:
        return 1
    if any(tag in kind for tag in ("v4", "v5p", "7")):
        return 2
    return 1


# ----------------------------------------------------------------------------
# Pallas kernel 1: Dice partial sums over channel-softmaxed logits.
#   a, b : (N, C, V) logits (a may be bf16); softmax over axis=1 in f32.
#   top[p] += sum_v softmax(a) * softmax(b)     (per n, c)
#   bot[p] += sum_v softmax(a) + softmax(b)     (per n, c)
# p indexes the leading "parallel" grid axis (re-summed in JAX afterwards).
# The ragged tail tile (V not a multiple of tile_v) is the only one that pays
# for the mask, via pl.when; all other tiles run the unmasked fast path.
# ----------------------------------------------------------------------------
def _dice_sums_kernel(a_ref, b_ref, top_ref, bot_ref, *,
                      v_total, tile_v, tiles_per_par, needs_mask):
    p = pl.program_id(0)
    t = pl.program_id(1)

    @pl.when(t == 0)
    def _():
        top_ref[...] = jnp.zeros_like(top_ref)
        bot_ref[...] = jnp.zeros_like(bot_ref)

    a = a_ref[...].astype(jnp.float32)            # (N, C, TV)
    b = b_ref[...].astype(jnp.float32)            # (N, C, TV)

    # Numerically-stable softmax over the channel axis; the divide goes to the
    # EUP via an approximate reciprocal (otherwise-idle slot).
    am = jnp.max(a, axis=1, keepdims=True)
    ae = jnp.exp(a - am)
    sa = ae * pl.reciprocal(jnp.sum(ae, axis=1, keepdims=True), approx=True)
    bm = jnp.max(b, axis=1, keepdims=True)
    be = jnp.exp(b - bm)
    sb = be * pl.reciprocal(jnp.sum(be, axis=1, keepdims=True), approx=True)

    prod = sa * sb
    ssum = sa + sb

    if needs_mask:
        # Nominal (unclamped) start of this tile; the index_map clamps the
        # actual DMA so duplicate / partial tiles re-read valid data, and this
        # mask zeroes their contribution.
        base = (p * tiles_per_par + t) * tile_v
        fully_valid = base + tile_v <= v_total

        @pl.when(fully_valid)
        def _():
            top_ref[...] += jnp.sum(prod, axis=2)[None]
            bot_ref[...] += jnp.sum(ssum, axis=2)[None]

        @pl.when(jnp.logical_not(fully_valid))
        def _():
            lane = jax.lax.broadcasted_iota(jnp.int32, (1, 1, tile_v), 2)
            valid = base + lane < v_total
            top_ref[...] += jnp.sum(jnp.where(valid, prod, 0.0), axis=2)[None]
            bot_ref[...] += jnp.sum(jnp.where(valid, ssum, 0.0), axis=2)[None]
    else:
        top_ref[...] += jnp.sum(prod, axis=2)[None]
        bot_ref[...] += jnp.sum(ssum, axis=2)[None]


def _pallas_dice_sums(a, b, *, tile_v=16384, n_par=2):
    """a, b: (N, C, V) logits (unpadded) -> (top, bot) each (N, C) f32 sums."""
    N, C, V = a.shape

    if tile_v >= V:
        tv = V                                   # full dim: always a legal block
    else:
        tv = max(128, (tile_v // 128) * 128)     # lane-aligned interior tile

    T_total = pl.cdiv(V, tv)                     # tiles needed to cover V
    T = pl.cdiv(T_total, n_par)                  # tiles per parallel slot
    last_block = T_total - 1
    needs_mask = (V % tv != 0) or (n_par * T != T_total)

    kernel = functools.partial(_dice_sums_kernel, v_total=V, tile_v=tv,
                               tiles_per_par=T, needs_mask=needs_mask)
    in_map = lambda p, t: (0, 0, jnp.minimum(p * T + t, last_block))
    out_map = lambda p, t: (p, 0, 0)

    bytes_accessed = int(N * C * V * (a.dtype.itemsize + b.dtype.itemsize)
                         + 2 * n_par * N * C * 4)

    top, bot = pl.pallas_call(
        kernel,
        out_shape=(jax.ShapeDtypeStruct((n_par, N, C), jnp.float32),
                   jax.ShapeDtypeStruct((n_par, N, C), jnp.float32)),
        grid_spec=pltpu.PrefetchScalarGridSpec(
            num_scalar_prefetch=0,
            grid=(n_par, T),
            in_specs=[pl.BlockSpec((N, C, tv), in_map),
                      pl.BlockSpec((N, C, tv), in_map)],
            out_specs=[pl.BlockSpec((1, N, C), out_map),
                       pl.BlockSpec((1, N, C), out_map)],
        ),
        compiler_params=pltpu.CompilerParams(
            dimension_semantics=("parallel", "arbitrary"),
            vmem_limit_bytes=_VMEM_LIMIT),
        cost_estimate=pl.CostEstimate(
            flops=int(14 * N * C * V),
            transcendentals=int(2 * N * C * V),
            bytes_accessed=bytes_accessed),
    )(a, b)
    return top.sum(axis=0), bot.sum(axis=0)


# ----------------------------------------------------------------------------
# Pallas kernel 2: per-voxel local-NCC correlation term + global sum.
# Inputs are the five 9^3 box sums viewed copy-free as (N*D1, D2*D3) f32.
# Lane-dense (1, cols) accumulator per parallel slot; ragged row tail masked
# only on the boundary tile.
# ----------------------------------------------------------------------------
def _ncc_cc_kernel(i_ref, j_ref, i2_ref, j2_ref, ij_ref, acc_ref, *,
                   win_size, rows_total, row_tile, tiles_per_par, needs_mask):
    p = pl.program_id(0)
    t = pl.program_id(1)

    @pl.when(t == 0)
    def _():
        acc_ref[...] = jnp.zeros_like(acc_ref)

    inv_w = 1.0 / win_size
    I_sum = i_ref[...]
    J_sum = j_ref[...]
    # Simplified algebra: cross = IJ - I*J/W, var = X2 - X*X/W.
    cross = ij_ref[...] - I_sum * J_sum * inv_w
    I_var = i2_ref[...] - I_sum * I_sum * inv_w
    J_var = j2_ref[...] - J_sum * J_sum * inv_w
    # HBM-bound kernel -> full-precision reciprocal is free and closer to the
    # PyTorch reference.
    cc = (cross * cross) * pl.reciprocal(I_var * J_var + 1e-5, approx=False)

    if needs_mask:
        base = (p * tiles_per_par + t) * row_tile
        fully_valid = base + row_tile <= rows_total

        @pl.when(fully_valid)
        def _():
            acc_ref[...] += jnp.sum(cc, axis=0, keepdims=True)[None]

        @pl.when(jnp.logical_not(fully_valid))
        def _():
            row = jax.lax.broadcasted_iota(jnp.int32, cc.shape, 0)
            valid = base + row < rows_total
            acc_ref[...] += jnp.sum(jnp.where(valid, cc, 0.0),
                                    axis=0, keepdims=True)[None]
    else:
        acc_ref[...] += jnp.sum(cc, axis=0, keepdims=True)[None]


def _pallas_ncc_cc_sum(sums, *, win_size, n_par=2):
    """sums: five (N, 1, D1, D2, D3) f32 box sums. Returns sum over voxels of cc."""
    N, _, D1, D2, D3 = sums[0].shape
    rows = N * D1
    cols = D2 * D3
    # Copy-free merge of contiguous dims: no flatten / jnp.pad HBM pass.
    arrs = [x.reshape(rows, cols) for x in sums]

    rt = max(8, (_NCC_BLOCK_BYTES // (cols * 4)) // 8 * 8)
    if rt >= rows:
        rt = rows                                 # full-dim block: always legal
    R_total = pl.cdiv(rows, rt)
    T = pl.cdiv(R_total, n_par)
    last_block = R_total - 1
    needs_mask = (rows % rt != 0) or (n_par * T != R_total)

    kernel = functools.partial(_ncc_cc_kernel, win_size=float(win_size),
                               rows_total=rows, row_tile=rt,
                               tiles_per_par=T, needs_mask=needs_mask)
    in_map = lambda p, t: (jnp.minimum(p * T + t, last_block), 0)
    out_map = lambda p, t: (p, 0, 0)

    acc = pl.pallas_call(
        kernel,
        out_shape=jax.ShapeDtypeStruct((n_par, 1, cols), jnp.float32),
        grid_spec=pltpu.PrefetchScalarGridSpec(
            num_scalar_prefetch=0,
            grid=(n_par, T),
            in_specs=[pl.BlockSpec((rt, cols), in_map) for _ in range(5)],
            out_specs=pl.BlockSpec((1, 1, cols), out_map),
        ),
        compiler_params=pltpu.CompilerParams(
            dimension_semantics=("parallel", "arbitrary"),
            vmem_limit_bytes=_VMEM_LIMIT),
        cost_estimate=pl.CostEstimate(
            flops=int(12 * rows * cols),
            transcendentals=int(rows * cols),
            bytes_accessed=int(5 * rows * cols * 4 + n_par * cols * 4)),
    )(*arrs)
    return jnp.sum(acc)


# ----------------------------------------------------------------------------
# 9x9x9 box-filter sums (== F.conv3d with a ones filter, stride 1, padding 4),
# done as three separable 1-D zero-padded window sums.
# TODO(synk): the innermost z-pass could be fused into the NCC Pallas kernel
#             with pltpu.roll shifted adds to save ~2 full-volume passes/array.
# ----------------------------------------------------------------------------
def _box_sum_3d(x, win=(9, 9, 9)):
    out = x
    for axis, w in zip((2, 3, 4), win):
        dims = [1] * out.ndim
        dims[axis] = w
        pads = [(0, 0)] * out.ndim
        pads[axis] = (w // 2, w // 2)
        out = jax.lax.reduce_window(out, 0.0, jax.lax.add,
                                    tuple(dims), (1,) * out.ndim, tuple(pads))
    return out


def nas_ncc(I, J, *, n_par=2):
    # I, J: [N, 1, D1, D2, D3]
    win = (9, 9, 9)
    win_size = float(win[0] * win[1] * win[2])
    I = I.astype(jnp.float32)
    J = J.astype(jnp.float32)
    I_sum = _box_sum_3d(I, win)
    J_sum = _box_sum_3d(J, win)
    I2_sum = _box_sum_3d(I * I, win)
    J2_sum = _box_sum_3d(J * J, win)
    IJ_sum = _box_sum_3d(I * J, win)
    cc_sum = _pallas_ncc_cc_sum([I_sum, J_sum, I2_sum, J2_sum, IJ_sum],
                                win_size=win_size, n_par=n_par)
    return -(cc_sum / jnp.float32(I_sum.size))


# ----------------------------------------------------------------------------
# gradient_loss (L2 penalty on flow spatial gradients).
# TODO(synk): strided neighbor differences kept in fused XLA; cheap relative to
#             the NCC / Dice kernels and awkward to tile across block edges.
# ----------------------------------------------------------------------------
def gradient_loss_l2(s):
    s = s.astype(jnp.float32)
    dy = s[:, :, 1:, :, :] - s[:, :, :-1, :, :]
    dx = s[:, :, :, 1:, :] - s[:, :, :, :-1, :]
    dz = s[:, :, :, :, 1:] - s[:, :, :, :, :-1]
    d = jnp.mean(dx * dx) + jnp.mean(dy * dy) + jnp.mean(dz * dz)
    return d / 3.0


# ----------------------------------------------------------------------------
# SpatialTransformer (voxelmorph-style): trilinear warp of src by flow,
# identity grid + flow in voxel units, zero padding outside the volume.
# Gather is done in channel-last (N, V, C) layout so each of the 8 corner
# gathers moves contiguous C-wide rows; result cast to out_dtype before the
# relayout back to channel-first.
# TODO(synk): data-dependent trilinear gather kept in plain JAX (no clean
#             Pallas TPU equivalent for per-voxel gather).
# ----------------------------------------------------------------------------
def spatial_transform_trilinear(src, flow, out_dtype=None):
    # src: [N, C, D1, D2, D3] float, flow: [N, 3, D1, D2, D3] float
    N, C, D1, D2, D3 = src.shape
    dims = (D1, D2, D3)
    V = D1 * D2 * D3
    if out_dtype is None:
        out_dtype = src.dtype
    src = src.astype(jnp.float32)
    flow = flow.astype(jnp.float32)

    g = jnp.meshgrid(
        jnp.arange(D1, dtype=jnp.float32),
        jnp.arange(D2, dtype=jnp.float32),
        jnp.arange(D3, dtype=jnp.float32),
        indexing="ij",
    )
    coords = [g[i][None] + flow[:, i] for i in range(3)]   # each [N, D1, D2, D3]
    floors = [jnp.floor(c) for c in coords]

    # Channel-last gather source: each gathered row is C contiguous floats.
    src_cl = jnp.transpose(src, (0, 2, 3, 4, 1)).reshape(N, V, C)
    out = jnp.zeros((N, V, C), jnp.float32)
    for dx in (0.0, 1.0):
        for dy in (0.0, 1.0):
            for dz in (0.0, 1.0):
                corner = [floors[0] + dx, floors[1] + dy, floors[2] + dz]
                w = jnp.ones_like(coords[0])
                for ci in range(3):
                    w = w * (1.0 - jnp.abs(coords[ci] - corner[ci]))
                valid = (
                    (corner[0] >= 0) & (corner[0] <= D1 - 1)
                    & (corner[1] >= 0) & (corner[1] <= D2 - 1)
                    & (corner[2] >= 0) & (corner[2] <= D3 - 1)
                )
                w = jnp.where(valid, w, 0.0)
                ic = [
                    jnp.clip(corner[i].astype(jnp.int32), 0, dims[i] - 1)
                    for i in range(3)
                ]
                flat_idx = ((ic[0] * D2 + ic[1]) * D3 + ic[2]).reshape(N, V)
                vals = jnp.take_along_axis(
                    src_cl,
                    jnp.broadcast_to(flat_idx[:, :, None], (N, V, C)),
                    axis=1,
                )
                out = out + vals * w.reshape(N, V, 1)
    out = out.astype(out_dtype)   # cast before relayout -> half the bytes moved
    return jnp.transpose(out.reshape(N, D1, D2, D3, C), (0, 4, 1, 2, 3))


# ----------------------------------------------------------------------------
# Full LossFunction_FixedEncoder_Reg_Dice forward
# TODO(synk): forward-only; the Pallas reductions define no custom VJP.
# ----------------------------------------------------------------------------
@functools.partial(jax.jit, static_argnames=("tile_v", "n_par", "use_bf16"))
def loss_function_fixed_encoder_reg_dice(y, tgt, flow, src_logits, tgt_logits,
                                         *, tile_v=16384, n_par=None,
                                         use_bf16=True):
    # y, tgt:      [N, 1, D1, D2, D3]  warped-moving / fixed images (for NCC)
    # flow:        [N, 3, D1, D2, D3]  displacement field (voxel units)
    # src_logits:  [N, C, D1, D2, D3]  moving segmentation logits
    # tgt_logits:  [N, C, D1, D2, D3]  fixed segmentation logits
    if n_par is None:
        n_par = _default_n_par()

    ncc = nas_ncc(tgt, y, n_par=n_par)
    grad = gradient_loss_l2(flow)

    # bf16 cast is folded into the warp's final fusion (no separate convert
    # pass); fixed logits are fed as native f32 (converting them would cost
    # more HBM traffic than it saves).
    warp_dtype = jnp.bfloat16 if use_bf16 else jnp.float32
    warped_src_logits = spatial_transform_trilinear(
        src_logits, flow, out_dtype=warp_dtype)

    N, C = src_logits.shape[:2]
    V = src_logits.shape[2] * src_logits.shape[3] * src_logits.shape[4]
    a = warped_src_logits.reshape(N, C, V)                    # copy-free reshape
    b = tgt_logits.astype(jnp.float32).reshape(N, C, V)       # copy-free reshape

    top, bot = _pallas_dice_sums(a, b, tile_v=tile_v, n_par=n_par)
    dice = -jnp.mean(2.0 * top / jnp.maximum(bot, 1e-5))

    loss = HYPER_NCC * ncc + HYPER_GRAD * grad + HYPER_DICE * dice
    return loss, ncc, grad, dice


if __name__ == "__main__":
    key = jax.random.PRNGKey(0)
    k0, k1, k2, k3, k4 = jax.random.split(key, 5)

    N, C, D1, D2, D3 = 2, NUM_CLASSES, 8, 8, 8
    y = jax.random.normal(k0, (N, 1, D1, D2, D3), dtype=jnp.float32)
    tgt = jax.random.normal(k1, (N, 1, D1, D2, D3), dtype=jnp.float32)
    flow = 0.5 * jax.random.normal(k2, (N, 3, D1, D2, D3), dtype=jnp.float32)
    src_logits = jax.random.normal(k3, (N, C, D1, D2, D3), dtype=jnp.float32)
    tgt_logits = jax.random.normal(k4, (N, C, D1, D2, D3), dtype=jnp.float32)

    loss, ncc, grad, dice = loss_function_fixed_encoder_reg_dice(
        y, tgt, flow, src_logits, tgt_logits)
    jax.block_until_ready((loss, ncc, grad, dice))
    print("KERNEL_OK")
</pallas_src>

<mosaic_0001>
module attributes {stable_mosaic.version = 11 : i64} {
  func.func @_dice_sums_kernel(%arg0: i32, %arg1: i32, %arg2: memref<2x14x512xbf16, #tpu.memory_space<vmem>>, %arg3: memref<2x14x512xf32, #tpu.memory_space<vmem>>, %arg4: memref<1x2x14xf32, #tpu.memory_space<vmem>>, %arg5: memref<1x2x14xf32, #tpu.memory_space<vmem>>) attributes {dimension_semantics = [#tpu.dimension_semantics<parallel>, #tpu.dimension_semantics<arbitrary>], iteration_bounds = array<i64: 1, 1>, scalar_prefetch = 0 : i64, scratch_operands = 0 : i64, tpu.core_type = #tpu.core_type<tc>, window_params = [{transform_indices = @transform_0, window_bounds = array<i64: 2, 14, 512>}, {transform_indices = @transform_1, window_bounds = array<i64: 2, 14, 512>}, {transform_indices = @transform_2, window_bounds = array<i64: 1, 2, 14>}, {transform_indices = @transform_3, window_bounds = array<i64: 1, 2, 14>}]} {
    %c0_i32 = arith.constant 0 : i32
    %0 = arith.cmpi eq, %arg1, %c0_i32 : i32
    %1 = arith.extui %0 : i1 to i32
    %c0_i32_0 = arith.constant 0 : i32
    %2 = arith.cmpi ne, %1, %c0_i32_0 : i32
    scf.if %2 {
      %cst_23 = arith.constant 0.000000e+00 : f32
      %38 = vector.broadcast %cst_23 : f32 to vector<1x2x14xf32>
      %c0_24 = arith.constant 0 : index
      %c0_25 = arith.constant 0 : index
      %c0_26 = arith.constant 0 : index
      %39 = vector.load %arg4[%c0_24, %c0_25, %c0_26] : memref<1x2x14xf32, #tpu.memory_space<vmem>>, vector<1x2x14xf32>
      tpu.vector_store %arg4[%c0_24, %c0_25, %c0_26], %38 {strides = array<i32>} : memref<1x2x14xf32, #tpu.memory_space<vmem>>, vector<1x2x14xf32>,
      %cst_27 = arith.constant 0.000000e+00 : f32
      %40 = vector.broadcast %cst_27 : f32 to vector<1x2x14xf32>
      %c0_28 = arith.constant 0 : index
      %c0_29 = arith.constant 0 : index
      %c0_30 = arith.constant 0 : index
      %41 = vector.load %arg5[%c0_28, %c0_29, %c0_30] : memref<1x2x14xf32, #tpu.memory_space<vmem>>, vector<1x2x14xf32>
      tpu.vector_store %arg5[%c0_28, %c0_29, %c0_30], %40 {strides = array<i32>} : memref<1x2x14xf32, #tpu.memory_space<vmem>>, vector<1x2x14xf32>,
    } else {
    }
    %c0 = arith.constant 0 : index
    %c0_1 = arith.constant 0 : index
    %c0_2 = arith.constant 0 : index
    %3 = vector.load %arg2[%c0, %c0_1, %c0_2] : memref<2x14x512xbf16, #tpu.memory_space<vmem>>, vector<2x14x512xbf16>
    %4 = arith.extf %3 : vector<2x14x512xbf16> to vector<2x14x512xf32>
    %c0_3 = arith.constant 0 : index
    %c0_4 = arith.constant 0 : index
    %c0_5 = arith.constant 0 : index
    %5 = vector.load %arg3[%c0_3, %c0_4, %c0_5] : memref<2x14x512xf32, #tpu.memory_space<vmem>>, vector<2x14x512xf32>
    %cst = arith.constant dense<0xFF800000> : vector<2x512xf32>
    %6 = vector.multi_reduction <maximumf>, %4, %cst [1] : vector<2x14x512xf32> to vector<2x512xf32>
    %7 = vector.shape_cast %6 : vector<2x512xf32> to vector<2x1x512xf32>
    %8 = vector.broadcast %7 : vector<2x1x512xf32> to vector<2x14x512xf32>
    %9 = arith.subf %4, %8 : vector<2x14x512xf32>
    %10 = math.exp %9 : vector<2x14x512xf32>
    %cst_6 = arith.constant dense<0.000000e+00> : vector<2x512xf32>
    %11 = vector.multi_reduction <add>, %10, %cst_6 [1] : vector<2x14x512xf32> to vector<2x512xf32>
    %12 = vector.shape_cast %11 : vector<2x512xf32> to vector<2x1x512xf32>
    %13 = tpu.reciprocal %12 {approx = true} : vector<2x1x512xf32> -> vector<2x1x512xf32>
    %14 = vector.broadcast %13 : vector<2x1x512xf32> to vector<2x14x512xf32>
    %15 = arith.mulf %10, %14 : vector<2x14x512xf32>
    %cst_7 = arith.constant dense<0xFF800000> : vector<2x512xf32>
    %16 = vector.multi_reduction <maximumf>, %5, %cst_7 [1] : vector<2x14x512xf32> to vector<2x512xf32>
    %17 = vector.shape_cast %16 : vector<2x512xf32> to vector<2x1x512xf32>
    %18 = vector.broadcast %17 : vector<2x1x512xf32> to vector<2x14x512xf32>
    %19 = arith.subf %5, %18 : vector<2x14x512xf32>
    %20 = math.exp %19 : vector<2x14x512xf32>
    %cst_8 = arith.constant dense<0.000000e+00> : vector<2x512xf32>
    %21 = vector.multi_reduction <add>, %20, %cst_8 [1] : vector<2x14x512xf32> to vector<2x512xf32>
    %22 = vector.shape_cast %21 : vector<2x512xf32> to vector<2x1x512xf32>
    %23 = tpu.reciprocal %22 {approx = true} : vector<2x1x512xf32> -> vector<2x1x512xf32>
    %24 = vector.broadcast %23 : vector<2x1x512xf32> to vector<2x14x512xf32>
    %25 = arith.mulf %20, %24 : vector<2x14x512xf32>
    %26 = arith.mulf %15, %25 : vector<2x14x512xf32>
    %27 = arith.addf %15, %25 : vector<2x14x512xf32>
    %c0_9 = arith.constant 0 : index
    %c0_10 = arith.constant 0 : index
    %c0_11 = arith.constant 0 : index
    %28 = vector.load %arg4[%c0_9, %c0_10, %c0_11] : memref<1x2x14xf32, #tpu.memory_space<vmem>>, vector<1x2x14xf32>
    %cst_12 = arith.constant dense<0.000000e+00> : vector<2x14xf32>
    %29 = vector.multi_reduction <add>, %26, %cst_12 [2] : vector<2x14x512xf32> to vector<2x14xf32>
    %30 = vector.shape_cast %29 : vector<2x14xf32> to vector<1x2x14xf32>
    %31 = arith.addf %28, %30 : vector<1x2x14xf32>
    %c0_13 = arith.constant 0 : index
    %c0_14 = arith.constant 0 : index
    %c0_15 = arith.constant 0 : index
    %32 = vector.load %arg4[%c0_13, %c0_14, %c0_15] : memref<1x2x14xf32, #tpu.memory_space<vmem>>, vector<1x2x14xf32>
    tpu.vector_store %arg4[%c0_13, %c0_14, %c0_15], %31 {strides = array<i32>} : memref<1x2x14xf32, #tpu.memory_space<vmem>>, vector<1x2x14xf32>,
    %c0_16 = arith.constant 0 : index
    %c0_17 = arith.constant 0 : index
    %c0_18 = arith.constant 0 : index
    %33 = vector.load %arg5[%c0_16, %c0_17, %c0_18] : memref<1x2x14xf32, #tpu.memory_space<vmem>>, vector<1x2x14xf32>
    %cst_19 = arith.constant dense<0.000000e+00> : vector<2x14xf32>
    %34 = vector.multi_reduction <add>, %27, %cst_19 [2] : vector<2x14x512xf32> to vector<2x14xf32>
    %35 = vector.shape_cast %34 : vector<2x14xf32> to vector<1x2x14xf32>
    %36 = arith.addf %33, %35 : vector<1x2x14xf32>
    %c0_20 = arith.constant 0 : index
    %c0_21 = arith.constant 0 : index
    %c0_22 = arith.constant 0 : index
    %37 = vector.load %arg5[%c0_20, %c0_21, %c0_22] : memref<1x2x14xf32, #tpu.memory_space<vmem>>, vector<1x2x14xf32>
    tpu.vector_store %arg5[%c0_20, %c0_21, %c0_22], %36 {strides = array<i32>} : memref<1x2x14xf32, #tpu.memory_space<vmem>>, vector<1x2x14xf32>,
    return
  }
  func.func @transform_0(%arg0: i32, %arg1: i32) -> (i32, i32, i32) {
    %c1_i32 = arith.constant 1 : i32
    %0 = arith.muli %arg0, %c1_i32 : i32
    %1 = arith.addi %0, %arg1 : i32
    %c0_i32 = arith.constant 0 : i32
    %2 = arith.minsi %1, %c0_i32 : i32
    %c0_i32_0 = arith.constant 0 : i32
    %c0_i32_1 = arith.constant 0 : i32
    %c0_i32_2 = arith.constant 0 : i32
    return %c0_i32_0, %c0_i32_1, %2 : i32, i32, i32
  }
  func.func @transform_1(%arg0: i32, %arg1: i32) -> (i32, i32, i32) {
    %c1_i32 = arith.constant 1 : i32
    %0 = arith.muli %arg0, %c1_i32 : i32
    %1 = arith.addi %0, %arg1 : i32
    %c0_i32 = arith.constant 0 : i32
    %2 = arith.minsi %1, %c0_i32 : i32
    %c0_i32_0 = arith.constant 0 : i32
    %c0_i32_1 = arith.constant 0 : i32
    %c0_i32_2 = arith.constant 0 : i32
    return %c0_i32_0, %c0_i32_1, %2 : i32, i32, i32
  }
  func.func @transform_2(%arg0: i32, %arg1: i32) -> (i32, i32, i32) {
    %c0_i32 = arith.constant 0 : i32
    %c0_i32_0 = arith.constant 0 : i32
    %c0_i32_1 = arith.constant 0 : i32
    return %arg0, %c0_i32, %c0_i32_0 : i32, i32, i32
  }
  func.func @transform_3(%arg0: i32, %arg1: i32) -> (i32, i32, i32) {
    %c0_i32 = arith.constant 0 : i32
    %c0_i32_0 = arith.constant 0 : i32
    %c0_i32_1 = arith.constant 0 : i32
    return %arg0, %c0_i32, %c0_i32_0 : i32, i32, i32
  }
}

module attributes {stable_mosaic.version = 11 : i64} {
  func.func @_ncc_cc_kernel(%arg0: i32, %arg1: i32, %arg2: memref<16x64xf32, #tpu.memory_space<vmem>>, %arg3: memref<16x64xf32, #tpu.memory_space<vmem>>, %arg4: memref<16x64xf32, #tpu.memory_space<vmem>>, %arg5: memref<16x64xf32, #tpu.memory_space<vmem>>, %arg6: memref<16x64xf32, #tpu.memory_space<vmem>>, %arg7: memref<1x1x64xf32, #tpu.memory_space<vmem>>) attributes {dimension_semantics = [#tpu.dimension_semantics<parallel>, #tpu.dimension_semantics<arbitrary>], iteration_bounds = array<i64: 1, 1>, scalar_prefetch = 0 : i64, scratch_operands = 0 : i64, tpu.core_type = #tpu.core_type<tc>, window_params = [{transform_indices = @transform_0, window_bounds = array<i64: 16, 64>}, {transform_indices = @transform_1, window_bounds = array<i64: 16, 64>}, {transform_indices = @transform_2, window_bounds = array<i64: 16, 64>}, {transform_indices = @transform_3, window_bounds = array<i64: 16, 64>}, {transform_indices = @transform_4, window_bounds = array<i64: 16, 64>}, {transform_indices = @transform_5, window_bounds = array<i64: 1, 1, 64>}]} {
    %c0_i32 = arith.constant 0 : i32
    %0 = arith.cmpi eq, %arg1, %c0_i32 : i32
    %1 = arith.extui %0 : i1 to i32
    %c0_i32_0 = arith.constant 0 : i32
    %2 = arith.cmpi ne, %1, %c0_i32_0 : i32
    scf.if %2 {
      %cst_20 = arith.constant 0.000000e+00 : f32
      %32 = vector.broadcast %cst_20 : f32 to vector<1x1x64xf32>
      %c0_21 = arith.constant 0 : index
      %c0_22 = arith.constant 0 : index
      %c0_23 = arith.constant 0 : index
      %33 = vector.load %arg7[%c0_21, %c0_22, %c0_23] : memref<1x1x64xf32, #tpu.memory_space<vmem>>, vector<1x1x64xf32>
      tpu.vector_store %arg7[%c0_21, %c0_22, %c0_23], %32 {strides = array<i32>} : memref<1x1x64xf32, #tpu.memory_space<vmem>>, vector<1x1x64xf32>,
    } else {
    }
    %c0 = arith.constant 0 : index
    %c0_1 = arith.constant 0 : index
    %3 = vector.load %arg2[%c0, %c0_1] : memref<16x64xf32, #tpu.memory_space<vmem>>, vector<16x64xf32>
    %c0_2 = arith.constant 0 : index
    %c0_3 = arith.constant 0 : index
    %4 = vector.load %arg3[%c0_2, %c0_3] : memref<16x64xf32, #tpu.memory_space<vmem>>, vector<16x64xf32>
    %c0_4 = arith.constant 0 : index
    %c0_5 = arith.constant 0 : index
    %5 = vector.load %arg6[%c0_4, %c0_5] : memref<16x64xf32, #tpu.memory_space<vmem>>, vector<16x64xf32>
    %6 = arith.mulf %3, %4 : vector<16x64xf32>
    %cst = arith.constant 0.00137174211 : f32
    %7 = vector.broadcast %cst : f32 to vector<16x64xf32>
    %8 = arith.mulf %6, %7 : vector<16x64xf32>
    %9 = arith.subf %5, %8 : vector<16x64xf32>
    %c0_6 = arith.constant 0 : index
    %c0_7 = arith.constant 0 : index
    %10 = vector.load %arg4[%c0_6, %c0_7] : memref<16x64xf32, #tpu.memory_space<vmem>>, vector<16x64xf32>
    %11 = arith.mulf %3, %3 : vector<16x64xf32>
    %cst_8 = arith.constant 0.00137174211 : f32
    %12 = vector.broadcast %cst_8 : f32 to vector<16x64xf32>
    %13 = arith.mulf %11, %12 : vector<16x64xf32>
    %14 = arith.subf %10, %13 : vector<16x64xf32>
    %c0_9 = arith.constant 0 : index
    %c0_10 = arith.constant 0 : index
    %15 = vector.load %arg5[%c0_9, %c0_10] : memref<16x64xf32, #tpu.memory_space<vmem>>, vector<16x64xf32>
    %16 = arith.mulf %4, %4 : vector<16x64xf32>
    %cst_11 = arith.constant 0.00137174211 : f32
    %17 = vector.broadcast %cst_11 : f32 to vector<16x64xf32>
    %18 = arith.mulf %16, %17 : vector<16x64xf32>
    %19 = arith.subf %15, %18 : vector<16x64xf32>
    %20 = arith.mulf %9, %9 : vector<16x64xf32>
    %21 = arith.mulf %14, %19 : vector<16x64xf32>
    %cst_12 = arith.constant 9.99999974E-6 : f32
    %22 = vector.broadcast %cst_12 : f32 to vector<16x64xf32>
    %23 = arith.addf %21, %22 : vector<16x64xf32>
    %24 = tpu.reciprocal %23 : vector<16x64xf32> -> vector<16x64xf32>
    %25 = arith.mulf %20, %24 : vector<16x64xf32>
    %c0_13 = arith.constant 0 : index
    %c0_14 = arith.constant 0 : index
    %c0_15 = arith.constant 0 : index
    %26 = vector.load %arg7[%c0_13, %c0_14, %c0_15] : memref<1x1x64xf32, #tpu.memory_space<vmem>>, vector<1x1x64xf32>
    %cst_16 = arith.constant dense<0.000000e+00> : vector<64xf32>
    %27 = vector.multi_reduction <add>, %25, %cst_16 [0] : vector<16x64xf32> to vector<64xf32>
    %28 = vector.shape_cast %27 : vector<64xf32> to vector<1x64xf32>
    %29 = vector.shape_cast %28 : vector<1x64xf32> to vector<1x1x64xf32>
    %30 = arith.addf %26, %29 : vector<1x1x64xf32>
    %c0_17 = arith.constant 0 : index
    %c0_18 = arith.constant 0 : index
    %c0_19 = arith.constant 0 : index
    %31 = vector.load %arg7[%c0_17, %c0_18, %c0_19] : memref<1x1x64xf32, #tpu.memory_space<vmem>>, vector<1x1x64xf32>
    tpu.vector_store %arg7[%c0_17, %c0_18, %c0_19], %30 {strides = array<i32>} : memref<1x1x64xf32, #tpu.memory_space<vmem>>, vector<1x1x64xf32>,
    return
  }
  func.func @transform_0(%arg0: i32, %arg1: i32) -> (i32, i32) {
    %c1_i32 = arith.constant 1 : i32
    %0 = arith.muli %arg0, %c1_i32 : i32
    %1 = arith.addi %0, %arg1 : i32
    %c0_i32 = arith.constant 0 : i32
    %2 = arith.minsi %1, %c0_i32 : i32
    %c0_i32_0 = arith.constant 0 : i32
    %c0_i32_1 = arith.constant 0 : i32
    return %2, %c0_i32_0 : i32, i32
  }
  func.func @transform_1(%arg0: i32, %arg1: i32) -> (i32, i32) {
    %c1_i32 = arith.constant 1 : i32
    %0 = arith.muli %arg0, %c1_i32 : i32
    %1 = arith.addi %0, %arg1 : i32
    %c0_i32 = arith.constant 0 : i32
    %2 = arith.minsi %1, %c0_i32 : i32
    %c0_i32_0 = arith.constant 0 : i32
    %c0_i32_1 = arith.constant 0 : i32
    return %2, %c0_i32_0 : i32, i32
  }
  func.func @transform_2(%arg0: i32, %arg1: i32) -> (i32, i32) {
    %c1_i32 = arith.constant 1 : i32
    %0 = arith.muli %arg0, %c1_i32 : i32
    %1 = arith.addi %0, %arg1 : i32
    %c0_i32 = arith.constant 0 : i32
    %2 = arith.minsi %1, %c0_i32 : i32
    %c0_i32_0 = arith.constant 0 : i32
    %c0_i32_1 = arith.constant 0 : i32
    return %2, %c0_i32_0 : i32, i32
  }
  func.func @transform_3(%arg0: i32, %arg1: i32) -> (i32, i32) {
    %c1_i32 = arith.constant 1 : i32
    %0 = arith.muli %arg0, %c1_i32 : i32
    %1 = arith.addi %0, %arg1 : i32
    %c0_i32 = arith.constant 0 : i32
    %2 = arith.minsi %1, %c0_i32 : i32
    %c0_i32_0 = arith.constant 0 : i32
    %c0_i32_1 = arith.constant 0 : i32
    return %2, %c0_i32_0 : i32, i32
  }
  func.func @transform_4(%arg0: i32, %arg1: i32) -> (i32, i32) {
    %c1_i32 = arith.constant 1 : i32
    %0 = arith.muli %arg0, %c1_i32 : i32
    %1 = arith.addi %0, %arg1 : i32
    %c0_i32 = arith.constant 0 : i32
    %2 = arith.minsi %1, %c0_i32 : i32
    %c0_i32_0 = arith.constant 0 : i32
    %c0_i32_1 = arith.constant 0 : i32
    return %2, %c0_i32_0 : i32, i32
  }
  func.func @transform_5(%arg0: i32, %arg1: i32) -> (i32, i32, i32) {
    %c0_i32 = arith.constant 0 : i32
    %c0_i32_0 = arith.constant 0 : i32
    %c0_i32_1 = arith.constant 0 : i32
    return %arg0, %c0_i32, %c0_i32_0 : i32, i32, i32
  }
}

</mosaic_0001>

<bundles_post_ra>
// kernel: loss_function_fixed_encoder_reg_dice.3
= control target key start
LH: loop header
LB: loop body
LE: loop exit
PB: predicated region body
PF: predicated region fallthrough
CT: control target
= control target key end

     0   :  { %vm124_vm0 = vcmask 1045504   ;;  %vm81_vm1 = vcmask 107520   ;;  %vm595_vm2 = vcmask 130112   ;;  %vm600_vm3 = vcmask 1041409   ;;  %s1293_s0 = inlined_call_operand.vmem [shape: bf16[2,14,512], index: 0, kind: input, shape index: {}]   ;;  %s1294_s1 = inlined_call_operand.vmem [shape: f32[2,14,512], index: 1, kind: input, shape index: {}]   ;;  %s1295_s2 = inlined_call_operand.vmem [shape: f32[1,2,14], index: 2, kind: output, shape index: {0}]   ;;  %s1296_s3 = inlined_call_operand.vmem [shape: f32[1,2,14], index: 3, kind: output, shape index: {1}]  }
   0x1   :  { %v790_v0 = vld [vmem:[%s1293_s0 + $0x20] sm:$0xff]  ;;  %v795_v1 = vld [vmem:[%s1293_s0 + $0x28] sm:$0xff]  ;;  %v800_v2 = vld [vmem:[%s1293_s0 + $0x30] sm:$0x77] }
   0x2   :  { %v805_v3 = vld [vmem:[%s1293_s0 + $0x38] sm:$0x77]  ;;  %v100_v4 = vunpack.c.l.bf16 %v790_v0  ;;  %v101_v5 = vunpack.c.h.bf16 %v790_v0  ;;  %v102_v6 = vunpack.c.l.bf16 %v795_v1  ;;  %v103_v7 = vunpack.c.h.bf16 %v795_v1  ;;  %v818_v12 = vld [vmem:[%s1294_s1 + $0x60] sm:$0x3f]  ;;  %v823_v13 = vld [vmem:[%s1294_s1 + $0x68] sm:$0x3f] }
   0x3   :  { %v104_v8 = vunpack.c.l.bf16 %v800_v2  ;;  %v105_v9 = vunpack.c.h.bf16 %v800_v2  ;;  %v106_v10 = vunpack.c.l.bf16 %v805_v3  ;;  %v107_v11 = vunpack.c.h.bf16 %v805_v3  ;;  %v828_v14 = vld [vmem:[%s1294_s1 + $0x70] sm:$0x3f]  ;;  %v833_v15 = vld [vmem:[%s1294_s1 + $0x78] sm:$0x3f]  ;;  %v838_v16 = vld [vmem:[%s1294_s1 + $0x40] sm:$0xff] }
   0x4   :  { %v855_v21 = vld [vmem:[%s1294_s1 + $0x48] sm:$0xff]  ;;  %v860_v22 = vld [vmem:[%s1294_s1 + $0x50] sm:$0xff]  ;;  %v865_v23 = vld [vmem:[%s1294_s1 + $0x58] sm:$0xff]  ;;  %v357_v28 = vsel %vm124_vm0, %v818_v12, -inf  ;;  %v365_v29 = vsel %vm124_vm0, %v823_v13, -inf  ;;  %v373_v30 = vsel %vm124_vm0, %v828_v14, -inf }
   0x5   :  { %v157_v17 = vsel %vm124_vm0, %v104_v8, -inf  ;;  %v165_v18 = vsel %vm124_vm0, %v105_v9, -inf  ;;  %v173_v19 = vsel %vm124_vm0, %v106_v10, -inf  ;;  %v181_v20 = vsel %vm124_vm0, %v107_v11, -inf }
   0x6   :  { %v158_v24 = vmax.f32 %v100_v4, %v157_v17  ;;  %v166_v25 = vmax.f32 %v101_v5, %v165_v18  ;;  %v174_v26 = vmax.f32 %v102_v6, %v173_v19  ;;  %v182_v27 = vmax.f32 %v103_v7, %v181_v20 }
   0x7   :  { %v381_v31 = vsel %vm124_vm0, %v833_v15, -inf  ;;  %v358_v36 = vmax.f32 %v838_v16, %v357_v28  ;;  %v366_v37 = vmax.f32 %v855_v21, %v365_v29  ;;  %v374_v38 = vmax.f32 %v860_v22, %v373_v30 }
   0x8   :  { %v159_v32 = vrot.slane %v158_v24, 4  ;;  %v167_v33 = vrot.slane %v166_v25, 4  ;;  %v175_v34 = vrot.slane %v174_v26, 4  ;;  %v183_v35 = vrot.slane %v182_v27, 4 }
   0x9   :  { %v382_v39 = vmax.f32 %v865_v23, %v381_v31  ;;  %v359_v44 = vrot.slane %v358_v36, 4  ;;  %v367_v45 = vrot.slane %v366_v37, 4  ;;  %v375_v46 = vrot.slane %v374_v38, 4 }
   0xa   :  { %v160_v40 = vmax.f32 %v158_v24, %v159_v32  ;;  %v168_v41 = vmax.f32 %v166_v25, %v167_v33  ;;  %v176_v42 = vmax.f32 %v174_v26, %v175_v34  ;;  %v184_v43 = vmax.f32 %v182_v27, %v183_v35 }
   0xb   :  { %v383_v47 = vrot.slane %v382_v39, 4  ;;  %v360_v52 = vmax.f32 %v358_v36, %v359_v44  ;;  %v368_v53 = vmax.f32 %v366_v37, %v367_v45  ;;  %v376_v54 = vmax.f32 %v374_v38, %v375_v46 }
   0xc   :  { %v161_v48 = vrot.slane %v160_v40, 2  ;;  %v169_v49 = vrot.slane %v168_v41, 2  ;;  %v177_v50 = vrot.slane %v176_v42, 2  ;;  %v185_v51 = vrot.slane %v184_v43, 2 }
   0xd   :  { %v384_v55 = vmax.f32 %v382_v39, %v383_v47  ;;  %v361_v60 = vrot.slane %v360_v52, 2  ;;  %v369_v61 = vrot.slane %v368_v53, 2  ;;  %v377_v62 = vrot.slane %v376_v54, 2 }
   0xe   :  { %v162_v56 = vmax.f32 %v160_v40, %v161_v48  ;;  %v170_v57 = vmax.f32 %v168_v41, %v169_v49  ;;  %v178_v58 = vmax.f32 %v176_v42, %v177_v50  ;;  %v186_v59 = vmax.f32 %v184_v43, %v185_v51  ;;  %v911_v49 = vld [vmem:[%s1293_s0] sm:$0xff] }
   0xf   :  { %v385_v63 = vrot.slane %v384_v55, 2  ;;  %v362_v24 = vmax.f32 %v360_v52, %v361_v60  ;;  %v370_v25 = vmax.f32 %v368_v53, %v369_v61  ;;  %v378_v26 = vmax.f32 %v376_v54, %v377_v62 }
  0x10   :  { %v163_v17 = vrot.slane %v162_v56, 1  ;;  %v171_v18 = vrot.slane %v170_v57, 1  ;;  %v179_v19 = vrot.slane %v178_v58, 1  ;;  %v187_v20 = vrot.slane %v186_v59, 1 }
  0x11   :  { %v386_v27 = vmax.f32 %v384_v55, %v385_v63  ;;  %v363_v32 = vrot.slane %v362_v24, 1  ;;  %v371_v33 = vrot.slane %v370_v25, 1  ;;  %v379_v34 = vrot.slane %v378_v26, 1 }
  0x12   :  { %v164_v28 = vmax.f32 %v162_v56, %v163_v17  ;;  %v172_v29 = vmax.f32 %v170_v57, %v171_v18  ;;  %v180_v30 = vmax.f32 %v178_v58, %v179_v19  ;;  %v188_v31 = vmax.f32 %v186_v59, %v187_v20  ;;  %v942_v59 = vld [vmem:[%s1294_s1 + $0x28] sm:$0x3f] }
  0x13   :  { %v387_v35 = vrot.slane %v386_v27, 1  ;;  %v364_v44 = vmax.f32 %v362_v24, %v363_v32  ;;  %v380_v47 = vmax.f32 %v378_v26, %v379_v34  ;;  %v92_v58 = vunpack.c.l.bf16 %v911_v49 }
  0x14   :  { %v197_v36 = vsub.f32 %v100_v4, %v164_v28  ;;  %v198_v37 = vsub.f32 %v101_v5, %v172_v29  ;;  %v199_v38 = vsub.f32 %v102_v6, %v180_v30  ;;  %v200_v39 = vsub.f32 %v103_v7, %v188_v31 }
  0x15   :  { %v201_v40 = vsub.f32 %v104_v8, %v164_v28  ;;  %v202_v41 = vsub.f32 %v105_v9, %v172_v29  ;;  %v203_v42 = vsub.f32 %v106_v10, %v180_v30  ;;  %v204_v4 = vsub.f32 %v107_v11, %v188_v31 }
  0x16   :  { %v221_v0 = vmul.f32 1.442695, %v197_v36  ;;  %v223_v5 = vmul.f32 1.442695, %v198_v37  ;;  %v225_v43 = vmul.f32 1.442695, %v199_v38  ;;  %v372_v7 = vmax.f32 %v370_v25, %v371_v33 }
  0x17   :  { %v227_v6 = vmul.f32 1.442695, %v200_v39  ;;  %v229_v45 = vmul.f32 1.442695, %v201_v40  ;;  %v231_v1 = vmul.f32 1.442695, %v202_v41  ;;  %v388_v2 = vmax.f32 %v386_v27, %v387_v35 }
  0x18   :  { %670 = vpow2.f32 %v221_v0  ;;  %v233_v46 = vmul.f32 1.442695, %v203_v42  ;;  %v235_v8 = vmul.f32 1.442695, %v204_v4  ;;  %v397_v9 = vsub.f32 %v838_v16, %v364_v44 }
  0x19   :  { %672 = vpow2.f32 %v223_v5  ;;  %v398_v10 = vsub.f32 %v855_v21, %v372_v7  ;;  %v399_v3 = vsub.f32 %v860_v22, %v380_v47  ;;  %v401_v11 = vsub.f32 %v818_v12, %v364_v44  ;;  %v919_v21 = vld [vmem:[%s1293_s0 + $0x8] sm:$0xff]  ;;  %v924_v12 = vld [vmem:[%s1293_s0 + $0x10] sm:$0x77] }
  0x1a   :  { %674 = vpow2.f32 %v225_v43  ;;  %v402_v48 = vsub.f32 %v823_v13, %v372_v7  ;;  %v400_v50 = vsub.f32 %v865_v23, %v388_v2  ;;  %v403_v51 = vsub.f32 %v828_v14, %v380_v47  ;;  %v929_v13 = vld [vmem:[%s1293_s0 + $0x18] sm:$0x77] }
  0x1b   :  { %676 = vpow2.f32 %v227_v6  ;;  %v404_v16 = vsub.f32 %v833_v15, %v388_v2  ;;  %v421_v22 = vmul.f32 1.442695, %v397_v9  ;;  %v423_v14 = vmul.f32 1.442695, %v398_v10  ;;  %v934_v15 = vld [vmem:[%s1294_s1 + $0x20] sm:$0x3f] }
  0x1c   :  { %678 = vpow2.f32 %v229_v45  ;;  %v425_v23 = vmul.f32 1.442695, %v399_v3  ;;  %v427_v52 = vmul.f32 1.442695, %v400_v50  ;;  %v429_v53 = vmul.f32 1.442695, %v401_v11 }
  0x1d   :  { %680 = vpow2.f32 %v231_v1  ;;  %v431_v54 = vmul.f32 1.442695, %v402_v48  ;;  %v433_v56 = vmul.f32 1.442695, %v403_v51  ;;  %v435_v57 = vmul.f32 1.442695, %v404_v16 }
  0x1e   :  { %v936_v55 = vpop.eup %670  ;;  %682 = vpow2.f32 %v233_v46  ;;  %v93_v61 = vunpack.c.h.bf16 %v911_v49  ;;  %v94_v62 = vunpack.c.l.bf16 %v919_v21  ;;  %v95_v63 = vunpack.c.h.bf16 %v919_v21  ;;  %v1078_v49 = vld [vmem:[%s1294_s1 + $0x30] sm:$0x3f] }
  0x1f   :  { %v944_v60 = vpop.eup %672  ;;  %684 = vpow2.f32 %v235_v8  ;;  %v96_v18 = vunpack.c.l.bf16 %v924_v12  ;;  %v97_v19 = vunpack.c.h.bf16 %v924_v12  ;;  %v98_v20 = vunpack.c.l.bf16 %v929_v13 }
  0x20   :  { %v949_v17 = vpop.eup %674  ;;  %686 = vpow2.f32 %v421_v22  ;;  %v99_v25 = vunpack.c.h.bf16 %v929_v13  ;;  %v959_v26 = vsel %vm124_vm0, %v934_v15, -inf  ;;  %v963_v27 = vsel %vm124_vm0, %v942_v59, -inf }
  0x21   :  { %v954_v24 = vpop.eup %676  ;;  %688 = vpow2.f32 %v423_v14  ;;  %v125_v29 = vsel %vm124_vm0, %v96_v18, -inf  ;;  %v133_v30 = vsel %vm124_vm0, %v97_v19, -inf  ;;  %v141_v31 = vsel %vm124_vm0, %v98_v20, -inf }
  0x22   :  { %v965_v28 = vpop.eup %678  ;;  %690 = vpow2.f32 %v425_v23  ;;  %v126_v34 = vmax.f32 %v92_v58, %v125_v29  ;;  %v134_v35 = vmax.f32 %v93_v61, %v133_v30  ;;  %v142_v39 = vmax.f32 %v94_v62, %v141_v31 }
  0x23   :  { %v976_v32 = vpop.eup %680  ;;  %v269_v33 = vsel %vm124_vm0, %v965_v28, 0.0  ;;  %692 = vpow2.f32 %v427_v52  ;;  %v149_v50 = vsel %vm124_vm0, %v99_v25, -inf }
  0x24   :  { %v984_v36 = vpop.eup %682  ;;  %v270_v37 = vadd.f32 %v936_v55, %v269_v33  ;;  %v277_v38 = vsel %vm124_vm0, %v976_v32, 0.0  ;;  %694 = vpow2.f32 %v429_v53  ;;  %v127_v4 = vrot.slane %v126_v34, 4 }
  0x25   :  { %v991_v40 = vpop.eup %684  ;;  %v278_v41 = vadd.f32 %v944_v60, %v277_v38  ;;  %v285_v42 = vsel %vm124_vm0, %v984_v36, 0.0  ;;  %696 = vpow2.f32 %v431_v54  ;;  %v135_v2 = vrot.slane %v134_v35, 4 }
  0x26   :  { %v996_v0 = vpop.eup %686  ;;  %v271_v5 = vrot.slane %v270_v37, 4  ;;  %v286_v43 = vadd.f32 %v949_v17, %v285_v42  ;;  %v293_v44 = vsel %vm124_vm0, %v991_v40, 0.0  ;;  %698 = vpow2.f32 %v433_v56 }
  0x27   :  { %v1001_v6 = vpop.eup %688  ;;  %v279_v45 = vrot.slane %v278_v41, 4  ;;  %v294_v1 = vadd.f32 %v954_v24, %v293_v44  ;;  %700 = vpow2.f32 %v435_v57  ;;  %v128_v7 = vmax.f32 %v126_v34, %v127_v4 }
  0x28   :  { %v1004_v46 = vpop.eup %690  ;;  %v272_v8 = vadd.f32 %v271_v5, %v270_v37  ;;  %v287_v47 = vrot.slane %v286_v43, 4  ;;  %v143_v9 = vrot.slane %v142_v39, 4  ;;  %v136_v14 = vmax.f32 %v134_v35, %v135_v2 }
  0x29   :  { %v1006_v10 = vpop.eup %692  ;;  %v280_v3 = vadd.f32 %v279_v45, %v278_v41  ;;  %v295_v11 = vrot.slane %v294_v1, 4  ;;  %v129_v48 = vrot.slane %v128_v7, 2 }
  0x2a   :  { %v1011_v51 = vpop.eup %694  ;;  %v273_v16 = vrot.slane %v272_v8, 2  ;;  %v288_v22 = vadd.f32 %v287_v47, %v286_v43  ;;  %v144_v23 = vmax.f32 %v142_v39, %v143_v9 }
  0x2b   :  { %v1013_v52 = vpop.eup %696  ;;  %v281_v53 = vrot.slane %v280_v3, 2  ;;  %v296_v54 = vadd.f32 %v295_v11, %v294_v1  ;;  %v469_v56 = vsel %vm124_vm0, %v1011_v51, 0.0  ;;  %v130_v57 = vmax.f32 %v128_v7, %v129_v48 }
  0x2c   :  { %v1017_v29 = vpop.eup %698  ;;  %v274_v30 = vadd.f32 %v273_v16, %v272_v8  ;;  %v289_v31 = vrot.slane %v288_v22, 2  ;;  %v470_v33 = vadd.f32 %v996_v0, %v469_v56  ;;  %v477_v34 = vsel %vm124_vm0, %v1013_v52, 0.0 }
  0x2d   :  { %v1022_v37 = vpop.eup %700  ;;  %v282_v35 = vadd.f32 %v281_v53, %v280_v3  ;;  %v297_v38 = vrot.slane %v296_v54, 2  ;;  %v478_v39 = vadd.f32 %v1001_v6, %v477_v34  ;;  %v485_v41 = vsel %vm124_vm0, %v1017_v29, 0.0 }
  0x2e   :  { %v275_v42 = vrot.slane %v274_v30, 1  ;;  %v290_v4 = vadd.f32 %v289_v31, %v288_v22  ;;  %v471_v5 = vrot.slane %v470_v33, 4  ;;  %v486_v43 = vadd.f32 %v1004_v46, %v485_v41 }
  0x2f   :  { %v283_v44 = vrot.slane %v282_v35, 1  ;;  %v298_v45 = vadd.f32 %v297_v38, %v296_v54  ;;  %v479_v1 = vrot.slane %v478_v39, 4  ;;  %v493_v7 = vsel %vm124_vm0, %v1022_v37, 0.0 }
  0x30   :  { %v276_v8 = vadd.f32 %v275_v42, %v274_v30  ;;  %v291_v47 = vrot.slane %v290_v4, 1  ;;  %v472_v2 = vadd.f32 %v471_v5, %v470_v33  ;;  %v487_v9 = vrot.slane %v486_v43, 4 }
  0x31   :  { %v284_v3 = vadd.f32 %v283_v44, %v282_v35  ;;  %v299_v11 = vrot.slane %v298_v45, 1  ;;  %v480_v48 = vadd.f32 %v479_v1, %v478_v39  ;;  %v494_v16 = vadd.f32 %v1006_v10, %v493_v7 }
  0x32   :  { %v292_v53 = vadd.f32 %v291_v47, %v290_v4  ;;  %702 = vrcp.f32 %v276_v8  ;;  %v473_v22 = vrot.slane %v472_v2, 2  ;;  %v488_v56 = vadd.f32 %v487_v9, %v486_v43 }
  0x33   :  { %v300_v31 = vadd.f32 %v299_v11, %v298_v45  ;;  %704 = vrcp.f32 %v284_v3  ;;  %v481_v54 = vrot.slane %v480_v48, 2  ;;  %v495_v34 = vrot.slane %v494_v16, 4 }
  0x34   :  { %706 = vrcp.f32 %v292_v53  ;;  %v474_v38 = vadd.f32 %v473_v22, %v472_v2  ;;  %v489_v41 = vrot.slane %v488_v56, 2  ;;  %v131_v30 = vrot.slane %v130_v57, 1 }
  0x35   :  { %708 = vrcp.f32 %v300_v31  ;;  %v482_v33 = vadd.f32 %v481_v54, %v480_v48  ;;  %v496_v42 = vadd.f32 %v495_v34, %v494_v16  ;;  %v137_v35 = vrot.slane %v136_v14, 2 }
  0x36   :  { %v475_v5 = vrot.slane %v474_v38, 1  ;;  %v490_v39 = vadd.f32 %v489_v41, %v488_v56  ;;  %v132_v44 = vmax.f32 %v130_v57, %v131_v30  ;;  %v145_v1 = vrot.slane %v144_v23, 2 }
  0x37   :  { %v483_v4 = vrot.slane %v482_v33, 1  ;;  %v497_v7 = vrot.slane %v496_v42, 2  ;;  %v138_v8 = vmax.f32 %v136_v14, %v137_v35  ;;  %v150_v43 = vmax.f32 %v95_v63, %v149_v50 }
  0x38   :  { %v1033_v45 = vpop.eup %702  ;;  %v476_v47 = vadd.f32 %v475_v5, %v474_v38  ;;  %v491_v2 = vrot.slane %v490_v39, 1  ;;  %v146_v9 = vmax.f32 %v144_v23, %v145_v1  ;;  %v189_v3 = vsub.f32 %v92_v58, %v132_v44 }
  0x39   :  { %v1037_v11 = vpop.eup %704  ;;  %v1041_v57 = vmul.f32 %v1033_v45, %v936_v55  ;;  %v484_v48 = vadd.f32 %v483_v4, %v482_v33  ;;  %v498_v16 = vadd.f32 %v497_v7, %v496_v42  ;;  %v139_v14 = vrot.slane %v138_v8, 1  ;;  %v1068_v33 = vld [vmem:[%s1294_s1] sm:$0xff] }
  0x3a   :  { %v1043_v53 = vpop.eup %706  ;;  %v1047_v50 = vmul.f32 %v1037_v11, %v944_v60  ;;  %v492_v22 = vadd.f32 %v491_v2, %v490_v39  ;;  %710 = vrcp.f32 %v476_v47  ;;  %v147_v23 = vrot.slane %v146_v9, 1  ;;  %v1105_v2 = vld [vmem:[%s1294_s1 + $0x10] sm:$0xff] }
  0x3b   :  { %v1049_v56 = vpop.eup %708  ;;  %v1053_v58 = vmul.f32 %v1043_v53, %v949_v17  ;;  %v499_v55 = vrot.slane %v498_v16, 1  ;;  %712 = vrcp.f32 %v484_v48  ;;  %v140_v31 = vmax.f32 %v138_v8, %v139_v14  ;;  %v1120_v48 = vld [vmem:[%s1294_s1 + $0x38] sm:$0x3f] }
  0x3c   :  { %v1057_v54 = vmul.f32 %v1049_v56, %v954_v24  ;;  %714 = vrcp.f32 %v492_v22  ;;  %v148_v34 = vmax.f32 %v146_v9, %v147_v23  ;;  %v151_v60 = vrot.slane %v150_v43, 4  ;;  %v1073_v24 = vld [vmem:[%s1294_s1 + $0x8] sm:$0xff] }
  0x3d   :  { %v500_v38 = vadd.f32 %v499_v55, %v498_v16  ;;  %v190_v41 = vsub.f32 %v93_v61, %v140_v31  ;;  %v193_v30 = vsub.f32 %v96_v18, %v132_v44  ;;  %v194_v17 = vsub.f32 %v97_v19, %v140_v31 }
  0x3e   :  { %v152_v61 = vmax.f32 %v150_v43, %v151_v60  ;;  %v191_v12 = vsub.f32 %v94_v62, %v148_v34  ;;  %v195_v18 = vsub.f32 %v98_v20, %v148_v34  ;;  %v205_v19 = vmul.f32 1.442695, %v189_v3 }
  0x3f   :  { %716 = vrcp.f32 %v500_v38  ;;  %v207_v42 = vmul.f32 1.442695, %v190_v41  ;;  %v213_v35 = vmul.f32 1.442695, %v193_v30  ;;  %v215_v5 = vmul.f32 1.442695, %v194_v17 }
  0x40   :  { %v1084_v39 = vpop.eup %710  ;;  %v153_v44 = vrot.slane %v152_v61, 2  ;;  %718 = vpow2.f32 %v205_v19  ;;  %v209_v1 = vmul.f32 1.442695, %v191_v12  ;;  %v217_v4 = vmul.f32 1.442695, %v195_v18  ;;  %v1136_v38 = vld [vmem:[%s1294_s1 + $0x18] sm:$0xff] }
  0x41   :  { %v1086_v7 = vpop.eup %712  ;;  %v1090_v8 = vmul.f32 %v1084_v39, %v996_v0  ;;  %720 = vpow2.f32 %v207_v42  ;;  %v326_v62 = vmax.f32 %v1068_v33, %v959_v26  ;;  %v334_v20 = vmax.f32 %v1073_v24, %v963_v27 }
  0x42   :  { %v1096_v43 = vpop.eup %714  ;;  %v1100_v47 = vmul.f32 %v1086_v7, %v1001_v6  ;;  %v154_v0 = vmax.f32 %v152_v61, %v153_v44  ;;  %722 = vpow2.f32 %v209_v1  ;;  %v341_v9 = vsel %vm124_vm0, %v1078_v49, -inf }
  0x43   :  { %v1111_v26 = vmul.f32 %v1096_v43, %v1004_v46  ;;  %v533_v27 = vmul.f32 %v1090_v8, %v1041_v57  ;;  %724 = vpow2.f32 %v213_v35  ;;  %v327_v6 = vrot.slane %v326_v62, 4 }
  0x44   :  { %v534_v3 = vmul.f32 %v1100_v47, %v1047_v50  ;;  %v155_v16 = vrot.slane %v154_v0, 1  ;;  %726 = vpow2.f32 %v215_v5  ;;  %v335_v14 = vrot.slane %v334_v20, 4 }
  0x45   :  { %v1122_v22 = vpop.eup %716  ;;  %v535_v46 = vmul.f32 %v1111_v26, %v1053_v58  ;;  %728 = vpow2.f32 %v217_v4  ;;  %v328_v23 = vmax.f32 %v326_v62, %v327_v6  ;;  %v342_v55 = vmax.f32 %v1105_v2, %v341_v9 }
  0x46   :  { %v1127_v31 = vpop.eup %718  ;;  %v1131_v34 = vmul.f32 %v1122_v22, %v1006_v10  ;;  %v572_v60 = vadd.f32 %v534_v3, %v533_v27  ;;  %v156_v41 = vmax.f32 %v154_v0, %v155_v16  ;;  %v336_v30 = vmax.f32 %v334_v20, %v335_v14 }
  0x47   :  { %v1138_v17 = vpop.eup %720  ;;  %v329_v61 = vrot.slane %v328_v23, 2  ;;  %v343_v12 = vrot.slane %v342_v55, 4  ;;  %v349_v18 = vsel %vm124_vm0, %v1120_v48, -inf }
  0x48   :  { %v1142_v19 = vpop.eup %722  ;;  %v536_v10 = vmul.f32 %v1131_v34, %v1057_v54  ;;  %v573_v42 = vadd.f32 %v572_v60, %v535_v46  ;;  %v192_v35 = vsub.f32 %v95_v63, %v156_v41  ;;  %v196_v5 = vsub.f32 %v99_v25, %v156_v41 }
  0x49   :  { %v1150_v44 = vpop.eup %724  ;;  %v330_v1 = vmax.f32 %v328_v23, %v329_v61  ;;  %v337_v4 = vrot.slane %v336_v30, 2  ;;  %v344_v62 = vmax.f32 %v342_v55, %v343_v12  ;;  %v350_v20 = vmax.f32 %v1136_v38, %v349_v18 }
  0x4a   :  { %v1153_v0 = vpop.eup %726  ;;  %v574_v9 = vadd.f32 %v573_v42, %v536_v10  ;;  %v211_v27 = vmul.f32 1.442695, %v192_v35  ;;  %v219_v6 = vmul.f32 1.442695, %v196_v5  ;;  %v237_v3 = vsel %vm124_vm0, %v1150_v44, 0.0 }
  0x4b   :  { %1299 = vst [vmem:[#allocation2_spill] sm:$0xff] %v1153_v0  ;;  %v1157_v21 = vpop.eup %728  ;;  %v238_v13 = vadd.f32 %v1127_v31, %v237_v3  ;;  %v245_v63 = vsel %vm124_vm0, %v1153_v0, 0.0  ;;  %v331_v25 = vrot.slane %v330_v1, 1  ;;  %v338_v16 = vmax.f32 %v336_v30, %v337_v4 }
  0x4c   :  { %1300 = vst [vmem:[#allocation3_spill] sm:$0xff] %v1157_v21  ;;  %575 = vadd.xlane.f32.xlu1 %v574_v9  ;;  %730 = vpow2.f32 %v211_v27  ;;  %v246_v14 = vadd.f32 %v1138_v17, %v245_v63  ;;  %v253_v46 = vsel %vm124_vm0, %v1157_v21, 0.0  ;;  %v345_v23 = vrot.slane %v344_v62, 2 }
  0x4d   :  { %732 = vpow2.f32 %v219_v6  ;;  %v239_v55 = vrot.slane %v238_v13, 4  ;;  %v254_v60 = vadd.f32 %v1142_v19, %v253_v46  ;;  %v332_v41 = vmax.f32 %v330_v1, %v331_v25 }
  0x4e   :  { %v247_v61 = vrot.slane %v246_v14, 4  ;;  %v339_v12 = vrot.slane %v338_v16, 1  ;;  %v346_v18 = vmax.f32 %v344_v62, %v345_v23  ;;  %v351_v10 = vrot.slane %v350_v20, 4 }
  0x4f   :  { %v240_v42 = vadd.f32 %v239_v55, %v238_v13  ;;  %v255_v35 = vrot.slane %v254_v60, 4  ;;  %v389_v30 = vsub.f32 %v1068_v33, %v332_v41  ;;  %v393_v5 = vsub.f32 %v934_v15, %v332_v41 }
  0x50   :  { %v340_v4 = vmax.f32 %v338_v16, %v339_v12  ;;  %v347_v9 = vrot.slane %v346_v18, 1  ;;  %v352_v27 = vmax.f32 %v350_v20, %v351_v10  ;;  %v248_v3 = vadd.f32 %v247_v61, %v246_v14 }
  0x51   :  { %v256_v63 = vadd.f32 %v255_v35, %v254_v60  ;;  %v241_v21 = vrot.slane %v240_v42, 2  ;;  %v405_v25 = vmul.f32 1.442695, %v389_v30  ;;  %v413_v13 = vmul.f32 1.442695, %v393_v5 }
  0x52   :  { %v1168_v6 = vpop.eup %730  ;;  %v348_v46 = vmax.f32 %v346_v18, %v347_v9  ;;  %v353_v1 = vrot.slane %v352_v27, 2  ;;  %v390_v62 = vsub.f32 %v1073_v24, %v340_v4  ;;  %v249_v20 = vrot.slane %v248_v3, 2 }
  0x53   :  { %v1170_v0 = vpop.eup %732  ;;  %v257_v14 = vrot.slane %v256_v63, 2  ;;  %v394_v55 = vsub.f32 %v942_v59, %v340_v4  ;;  %v242_v60 = vadd.f32 %v241_v21, %v240_v42  ;;  %734 = vpow2.f32 %v405_v25 }
  0x54   :  { %v261_v33 = vsel %vm124_vm0, %v1170_v0, 0.0  ;;  %v354_v15 = vmax.f32 %v352_v27, %v353_v1  ;;  %v391_v16 = vsub.f32 %v1105_v2, %v348_v46  ;;  %v395_v12 = vsub.f32 %v1078_v49, %v348_v46 }
  0x55   :  { %v262_v23 = vadd.f32 %v1168_v6, %v261_v33  ;;  %v407_v24 = vmul.f32 1.442695, %v390_v62  ;;  %736 = vpow2.f32 %v413_v13  ;;  %v250_v35 = vadd.f32 %v249_v20, %v248_v3 }
  0x56   :  { %v355_v41 = vrot.slane %v354_v15, 1  ;;  %v409_v10 = vmul.f32 1.442695, %v391_v16  ;;  %v258_v30 = vadd.f32 %v257_v14, %v256_v63  ;;  %v415_v2 = vmul.f32 1.442695, %v394_v55 }
  0x57   :  { %v263_v61 = vrot.slane %v262_v23, 4  ;;  %v243_v9 = vrot.slane %v242_v60, 1  ;;  %738 = vpow2.f32 %v407_v24  ;;  %v417_v21 = vmul.f32 1.442695, %v395_v12 }
  0x58   :  { %v356_v18 = vmax.f32 %v354_v15, %v355_v41  ;;  %740 = vpow2.f32 %v409_v10  ;;  %v251_v25 = vrot.slane %v250_v35, 1  ;;  %v259_v3 = vrot.slane %v258_v30, 1 }
  0x59   :  { %v264_v5 = vadd.f32 %v263_v61, %v262_v23  ;;  %v1181_v42 = vpop.eup %734  ;;  %742 = vpow2.f32 %v415_v2  ;;  %v244_v63 = vadd.f32 %v243_v9, %v242_v60  ;;  %v321_v20 = vmul.f32 %v1033_v45, %v965_v28 }
  0x5a   :  { %v392_v27 = vsub.f32 %v1136_v38, %v356_v18  ;;  %v396_v1 = vsub.f32 %v1120_v48, %v356_v18  ;;  %v252_v33 = vadd.f32 %v251_v25, %v250_v35  ;;  %v260_v15 = vadd.f32 %v259_v3, %v258_v30 }
  0x5b   :  { %v265_v59 = vrot.slane %v264_v5, 2  ;;  %v1183_v46 = vpop.eup %736  ;;  %v322_v23 = vmul.f32 %v1037_v11, %v976_v32  ;;  %v521_v55 = vmul.f32 %v1084_v39, %v1011_v51  ;;  %v522_v60 = vmul.f32 %v1086_v7, %v1013_v52 }
  0x5c   :  { %v411_v49 = vmul.f32 1.442695, %v392_v27  ;;  %v419_v4 = vmul.f32 1.442695, %v396_v1  ;;  %v437_v38 = vsel %vm124_vm0, %v1183_v46, 0.0  ;;  %v323_v24 = vmul.f32 %v1043_v53, %v984_v36 }
  0x5d   :  { %v266_v62 = vadd.f32 %v265_v59, %v264_v5  ;;  %v438_v48 = vadd.f32 %v1181_v42, %v437_v38  ;;  %v1188_v13 = vpop.eup %738  ;;  %v523_v28 = vmul.f32 %v1096_v43, %v1017_v29  ;;  %v324_v51 = vmul.f32 %v1049_v56, %v991_v40 }
  0x5e   :  { %744 = vpow2.f32 %v411_v49  ;;  %v1192_v14 = vpop.eup %740  ;;  %v524_v52 = vmul.f32 %v1122_v22, %v1022_v37  ;;  %v537_v11 = vmul.f32 %v521_v55, %v321_v20  ;;  %v538_v53 = vmul.f32 %v522_v60, %v322_v23 }
  0x5f   :  { %746 = vpow2.f32 %v417_v21  ;;  %v439_v16 = vrot.slane %v438_v48, 4  ;;  %v1200_v41 = vpop.eup %742  ;;  %v267_v61 = vrot.slane %v266_v62, 1  ;;  %v539_v18 = vmul.f32 %v523_v28, %v323_v24 }
  0x60   :  { %748 = vpow2.f32 %v419_v4  ;;  %v445_v32 = vsel %vm124_vm0, %v1200_v41, 0.0  ;;  %v540_v10 = vmul.f32 %v524_v52, %v324_v51  ;;  %v577_v40 = vsel %vm124_vm0, %v537_v11, 0.0 }
  0x61   :  { %750 = vrcp.f32 %v244_v63  ;;  %v440_v12 = vadd.f32 %v439_v16, %v438_v48  ;;  %v446_v36 = vadd.f32 %v1188_v13, %v445_v32  ;;  %v268_v5 = vadd.f32 %v267_v61, %v266_v62 }
  0x62   :  { %752 = vrcp.f32 %v252_v33  ;;  %v578_v9 = vsel %vm124_vm0, %v538_v53, 0.0  ;;  %v580_v27 = vsel %vm124_vm0, %v539_v18, 0.0  ;;  %v582_v25 = vsel %vm124_vm0, %v540_v10, 0.0 }
  0x63   :  { %v441_v7 = vrot.slane %v440_v12, 2  ;;  %v447_v35 = vrot.slane %v446_v36, 4  ;;  %v579_v49 = vadd.f32 %v578_v9, %v577_v40  ;;  %754 = vrcp.f32 %v260_v15 }
  0x64   :  { %v1206_v45 = vpop.eup %744  ;;  %756 = vrcp.f32 %v268_v5  ;;  %v553_v16 = vadd.f32 %v521_v55, %v321_v20  ;;  %v554_v61 = vadd.f32 %v522_v60, %v322_v23  ;;  %v556_v53 = vadd.f32 %v524_v52, %v324_v51 }
  0x65   :  { %v1214_v39 = vpop.eup %746  ;;  %v442_v56 = vadd.f32 %v441_v7, %v440_v12  ;;  %v448_v59 = vadd.f32 %v447_v35, %v446_v36  ;;  %v581_v48 = vadd.f32 %v580_v27, %v579_v49  ;;  %v555_v36 = vadd.f32 %v523_v28, %v323_v24 }
  0x66   :  { %v1217_v29 = vpop.eup %748  ;;  %v453_v43 = vsel %vm124_vm0, %v1214_v39, 0.0  ;;  %v626_v15 = vsel %vm124_vm0, %v553_v16, 0.0  ;;  %v627_v10 = vsel %vm124_vm0, %v554_v61, 0.0  ;;  %v549_v40 = vadd.f32 %v1090_v8, %v1041_v57 }
  0x67   :  { %v454_v37 = vadd.f32 %v1192_v14, %v453_v43  ;;  %v461_v22 = vsel %vm124_vm0, %v1217_v29, 0.0  ;;  %v751_v30 = vpop.eup %750  ;;  %v443_v1 = vrot.slane %v442_v56, 1  ;;  %v449_v63 = vrot.slane %v448_v59, 2 }
  0x68   :  { %v462_v2 = vadd.f32 %v1206_v45, %v461_v22  ;;  %v753_v33 = vpop.eup %752  ;;  %v583_v11 = vadd.f32 %v582_v25, %v581_v48  ;;  %v628_v23 = vadd.f32 %v627_v10, %v626_v15  ;;  %v629_v55 = vsel %vm124_vm0, %v555_v36, 0.0 }
  0x69   :  { %v455_v21 = vrot.slane %v454_v37, 4  ;;  %v444_v3 = vadd.f32 %v443_v1, %v442_v56  ;;  %v450_v12 = vadd.f32 %v449_v63, %v448_v59  ;;  %v755_v56 = vpop.eup %754  ;;  %v631_v60 = vsel %vm124_vm0, %v556_v53, 0.0 }
  0x6a   :  { %v463_v4 = vrot.slane %v462_v2, 4  ;;  %584 = vadd.xlane.f32.xlu1 %v583_v11  ;;  %v550_v28 = vadd.f32 %v1100_v47, %v1047_v50  ;;  %v551_v51 = vadd.f32 %v1111_v26, %v1053_v58  ;;  %v757_v52 = vpop.eup %756  ;;  %v630_v22 = vadd.f32 %v629_v55, %v628_v23 }
  0x6b   :  { %v456_v38 = vadd.f32 %v455_v21, %v454_v37  ;;  %758 = vrcp.f32 %v444_v3  ;;  %v451_v18 = vrot.slane %v450_v12, 1  ;;  %v552_v57 = vadd.f32 %v1131_v34, %v1057_v54 }
  0x6c   :  { %v464_v62 = vadd.f32 %v463_v4, %v462_v2  ;;  %v313_v2 = vmul.f32 %v751_v30, %v1150_v44  ;;  %v621_v9 = vadd.f32 %v550_v28, %v549_v40  ;;  %v632_v59 = vadd.f32 %v631_v60, %v630_v22  ;;  %v1301_v4 = vld [vmem:[#allocation2_spill] sm:$0xff] }
  0x6d   :  { %v457_v32 = vrot.slane %v456_v38, 2  ;;  %v452_v35 = vadd.f32 %v451_v18, %v450_v12  ;;  %v309_v58 = vmul.f32 %v751_v30, %v1127_v31  ;;  %v310_v34 = vmul.f32 %v753_v33, %v1138_v17 }
  0x6e   :  { %v465_v7 = vrot.slane %v464_v62, 2  ;;  %v622_v50 = vadd.f32 %v621_v9, %v551_v51  ;;  %v311_v44 = vmul.f32 %v755_v56, %v1142_v19  ;;  %v312_v49 = vmul.f32 %v757_v52, %v1168_v6 }
  0x6f   :  { %v458_v43 = vadd.f32 %v457_v32, %v456_v38  ;;  %760 = vrcp.f32 %v452_v35  ;;  %v316_v48 = vmul.f32 %v757_v52, %v1170_v0 }
  0x70   :  { %v466_v20 = vadd.f32 %v465_v7, %v464_v62  ;;  %v623_v54 = vadd.f32 %v622_v50, %v552_v57 }
  0x71   :  { %v459_v24 = vrot.slane %v458_v43, 1  ;;  %v759_v8 = vpop.eup %758 }
  0x72   :  { %v467_v37 = vrot.slane %v466_v20, 1  ;;  %v513_v1 = vmul.f32 %v759_v8, %v1183_v46  ;;  %v509_v47 = vmul.f32 %v759_v8, %v1181_v42  ;;  %633 = vadd.xlane.f32.xlu1 %v632_v59  ;;  %v314_v46 = vmul.f32 %v753_v33, %v1301_v4  ;;  %v1302_v42 = vld [vmem:[#allocation3_spill] sm:$0xff] }
  0x73   :  { %v460_v5 = vadd.f32 %v459_v24, %v458_v43  ;;  %v315_v38 = vmul.f32 %v755_v56, %v1302_v42  ;;  %v766_v8 = vmov 0.0  }
  0x74   :  { %v468_v27 = vadd.f32 %v467_v37, %v466_v20  ;;  %v545_v26 = vadd.f32 %v513_v1, %v313_v2  ;;  %v541_v3 = vadd.f32 %v509_v47, %v309_v58  ;;  %v525_v63 = vmul.f32 %v509_v47, %v309_v58  ;;  %82 = vst.msk [vmem:[%s1295_s2] sm:$0x3] %vm81_vm1, %v766_v8 }
  0x75   :  { %762 = vrcp.f32 %v460_v5  ;;  %v761_v21 = vpop.eup %760  ;;  %v529_v62 = vmul.f32 %v513_v1, %v313_v2  ;;  %83 = vst.msk [vmem:[%s1296_s3] sm:$0x3] %vm81_vm1, %v766_v8  ;;  %v590_v2 = vlaneseq }
  0x76   :  { %764 = vrcp.f32 %v468_v27  ;;  %v510_v25 = vmul.f32 %v761_v21, %v1188_v13  ;;  %v514_v31 = vmul.f32 %v761_v21, %v1200_v41  ;;  %v612_v17 = vsel %vm124_vm0, %v545_v26, 0.0 }
  0x77   :  { %v563_v43 = vsel %vm124_vm0, %v529_v62, 0.0  ;;  %v591_v9 = vand.u32 127, %v590_v2 }
  0x78   :  { %v542_v6 = vadd.f32 %v510_v25, %v310_v34  ;;  %v526_v61 = vmul.f32 %v510_v25, %v310_v34  ;;  %v546_v41 = vadd.f32 %v514_v31, %v314_v46  ;;  %v530_v32 = vmul.f32 %v514_v31, %v314_v46 }
  0x79   :  { %v593_v1 = vadd.s32 4294967288, %v591_v9 }
  0x7a   :  { %v607_v7 = vadd.f32 %v542_v6, %v541_v3  ;;  %v558_v0 = vadd.f32 %v526_v61, %v525_v63  ;;  %v613_v40 = vsel %vm124_vm0, %v546_v41, 0.0  ;;  %v564_v60 = vsel %vm124_vm0, %v530_v32, 0.0 }
  0x7b   :  { %v763_v30 = vpop.eup %762  ;;  %v565_v24 = vadd.f32 %v564_v60, %v563_v43 }
  0x7c   :  { %v765_v16 = vpop.eup %764  ;;  %v511_v19 = vmul.f32 %v763_v30, %v1192_v14  ;;  %v515_v33 = vmul.f32 %v763_v30, %v1214_v39 }
  0x7d   :  { %v512_v13 = vmul.f32 %v765_v16, %v1206_v45  ;;  %v516_v12 = vmul.f32 %v765_v16, %v1217_v29  ;;  %v614_v45 = vadd.f32 %v613_v40, %v612_v17 }
  0x7e   :  { %v543_v11 = vadd.f32 %v511_v19, %v311_v44  ;;  %v527_v36 = vmul.f32 %v511_v19, %v311_v44  ;;  %v547_v18 = vadd.f32 %v515_v33, %v315_v38  ;;  %v531_v39 = vmul.f32 %v515_v33, %v315_v38  ;;  %v557_v44 = vld [vmem:[%s1295_s2] sm:$0x3] }
  0x7f   :  { %v544_v53 = vadd.f32 %v512_v13, %v312_v49  ;;  %v528_v15 = vmul.f32 %v512_v13, %v312_v49  ;;  %v548_v56 = vadd.f32 %v516_v12, %v316_v48  ;;  %v532_v20 = vmul.f32 %v516_v12, %v316_v48  ;;  %v606_v48 = vld [vmem:[%s1296_s3] sm:$0x3] }
  0x80   :  { %v608_v14 = vadd.f32 %v607_v7, %v543_v11  ;;  %v559_v10 = vadd.f32 %v558_v0, %v527_v36  ;;  %v615_v29 = vsel %vm124_vm0, %v547_v18, 0.0  ;;  %v566_v35 = vsel %vm124_vm0, %v531_v39, 0.0 }
  0x81   :  { %v616_v28 = vadd.f32 %v615_v29, %v614_v45  ;;  %v617_v51 = vsel %vm124_vm0, %v548_v56, 0.0  ;;  %v567_v52 = vadd.f32 %v566_v35, %v565_v24  ;;  %v568_v37 = vsel %vm124_vm0, %v532_v20, 0.0 }
  0x82   :  { %v609_v23 = vadd.f32 %v608_v14, %v544_v53  ;;  %v560_v55 = vadd.f32 %v559_v10, %v528_v15 }
  0x83   :  { %v618_v22 = vadd.f32 %v617_v51, %v616_v28  ;;  %v569_v57 = vadd.f32 %v568_v37, %v567_v52 }
  0x84   :  { %610 = vadd.xlane.f32.xlu2 %v609_v23  ;;  %561 = vadd.xlane.f32.xlu0 %v560_v55 }
  0x8c   :  { %619 = vadd.xlane.f32.xlu2 %v618_v22  ;;  %570 = vadd.xlane.f32.xlu0 %v569_v57 }
  0x94   :  { %624 = vadd.xlane.f32.xlu0 %v623_v54 }
  0xbf   :  { %v576_v5 = vpop.xlane.xlu1 %575 }
  0xc0   :  { %v597_v47 = vperm.slane %v576_v5, %v591_v9 }
  0xdd   :  { %v585_v50 = vpop.xlane.xlu1 %584 }
  0xde   :  { %v598_v58 = vperm.slane %v585_v50, %v593_v1 }
  0xe0   :  { %v599_v34 = vsel %vm595_vm2, %v598_v58, %v597_v47 }
  0xe5   :  { %v634_v25 = vpop.xlane.xlu1 %633 }
  0xe6   :  { %v643_v30 = vperm.slane %v634_v25, %v593_v1 }
  0xf7   :  { %v562_v27 = vpop.xlane.xlu0 %561  ;;  %v611_v59 = vpop.xlane.xlu2 %610 }
  0xf8   :  { %v592_v54 = vperm.slane %v562_v27, %v591_v9  ;;  %v639_v63 = vperm.slane %v611_v59, %v591_v9 }
  0xff   :  { %v571_v26 = vpop.xlane.xlu0 %570  ;;  %v620_v4 = vpop.xlane.xlu2 %619 }
 0x100   :  { %v594_v21 = vperm.slane %v571_v26, %v593_v1  ;;  %v640_v31 = vperm.slane %v620_v4, %v593_v1 }
 0x102   :  { %v596_v49 = vsel %vm595_vm2, %v594_v21, %v592_v54  ;;  %v641_v17 = vsel %vm595_vm2, %v640_v31, %v639_v63 }
 0x103   :  { %v601_v46 = vsel %vm600_vm3, %v599_v34, %v596_v49 }
 0x104   :  { %v603_v3 = vadd.f32 %v601_v46, %v557_v44 }
 0x106   :  { %605 = vst.msk [vmem:[%s1295_s2] sm:$0x3] %vm81_vm1, %v603_v3 }
 0x107   :  { %v625_v42 = vpop.xlane.xlu0 %624 }
 0x108   :  { %v642_v38 = vperm.slane %v625_v42, %v591_v9 }
 0x10a   :  { %v644_v62 = vsel %vm595_vm2, %v643_v30, %v642_v38 }
 0x10b   :  { %v645_v16 = vsel %vm600_vm3, %v644_v62, %v641_v17 }
 0x10c   :  { %v647_v19 = vadd.f32 %v645_v16, %v606_v48 }
 0x10e   :  { %648 = vst.msk [vmem:[%s1296_s3] sm:$0x3] %vm81_vm1, %v647_v19 }

// kernel: loss_function_fixed_encoder_reg_dice.2
= control target key start
LH: loop header
LB: loop body
LE: loop exit
PB: predicated region body
PF: predicated region fallthrough
CT: control target
= control target key end

     0   :  { %vm184_vm0 = vcmask 516096   ;;  %v303_v0 = vmov 0.0   ;;  %vm251_vm9 = vcmask 523264   ;;  %s375_s0 = inlined_call_operand.vmem [shape: f32[16,64], index: 0, kind: input, shape index: {}]   ;;  %s376_s1 = inlined_call_operand.vmem [shape: f32[16,64], index: 1, kind: input, shape index: {}]   ;;  %s377_s2 = inlined_call_operand.vmem [shape: f32[16,64], index: 2, kind: input, shape index: {}]   ;;  %s378_s5 = inlined_call_operand.vmem [shape: f32[1,1,64], index: 5, kind: output, shape index: {}]   ;;  %s379_s3 = inlined_call_operand.vmem [shape: f32[16,64], index: 3, kind: input, shape index: {}]   ;;  %s380_s4 = inlined_call_operand.vmem [shape: f32[16,64], index: 4, kind: input, shape index: {}]  }
   0x1   :  { %185 = vst.msk [vmem:[%s378_s5] sm:$0x1] %vm184_vm0, %v303_v0  ;;  %v186_v1 = vld [vmem:[%s375_s0] sm:$0xff]  ;;  %v187_v2 = vld [vmem:[%s375_s0 + $0x8] sm:$0xff] }
   0x2   :  { %v188_v3 = vld [vmem:[%s376_s1] sm:$0xff]  ;;  %v189_v4 = vld [vmem:[%s376_s1 + $0x8] sm:$0xff]  ;;  %v200_v5 = vmul.f32 %v186_v1, %v186_v1  ;;  %v201_v6 = vmul.f32 %v187_v2, %v187_v2 }
   0x3   :  { %v208_v7 = vmul.f32 %v188_v3, %v188_v3  ;;  %v198_v8 = vld [vmem:[%s377_s2] sm:$0xff]  ;;  %v199_v9 = vld [vmem:[%s377_s2 + $0x8] sm:$0xff]  ;;  %v209_v10 = vmul.f32 %v189_v4, %v189_v4  ;;  %v192_v24 = vmul.f32 %v188_v3, %v186_v1  ;;  %v193_v26 = vmul.f32 %v189_v4, %v187_v2 }
   0x4   :  { %v202_v11 = vmul.f32 0.0013717421, %v200_v5  ;;  %v203_v12 = vmul.f32 0.0013717421, %v201_v6  ;;  %v206_v13 = vld [vmem:[%s379_s3] sm:$0xff]  ;;  %v207_v14 = vld [vmem:[%s379_s3 + $0x8] sm:$0xff] }
   0x5   :  { %v210_v15 = vmul.f32 0.0013717421, %v208_v7  ;;  %v211_v18 = vmul.f32 0.0013717421, %v209_v10  ;;  %v194_v27 = vmul.f32 0.0013717421, %v192_v24 }
   0x6   :  { %v204_v16 = vsub.f32 %v198_v8, %v202_v11  ;;  %v205_v17 = vsub.f32 %v199_v9, %v203_v12  ;;  %v190_v28 = vld [vmem:[%s380_s4] sm:$0xff]  ;;  %v195_v29 = vmul.f32 0.0013717421, %v193_v26  ;;  %v191_v30 = vld [vmem:[%s380_s4 + $0x8] sm:$0xff] }
   0x7   :  { %v212_v19 = vsub.f32 %v206_v13, %v210_v15  ;;  %v213_v20 = vsub.f32 %v207_v14, %v211_v18  ;;  %v196_v33 = vsub.f32 %v190_v28, %v194_v27 }
   0x8   :  { %v197_v35 = vsub.f32 %v191_v30, %v195_v29  ;;  %v250_v1 = vld [vmem:[%s378_s5] sm:$0x1] }
   0x9   :  { %v216_v21 = vmul.f32 %v212_v19, %v204_v16  ;;  %v217_v22 = vmul.f32 %v213_v20, %v205_v17  ;;  %v214_v46 = vmul.f32 %v196_v33, %v196_v33 }
   0xa   :  { %v215_v49 = vmul.f32 %v197_v35, %v197_v35 }
   0xb   :  { %v218_v23 = vadd.f32 1e-05, %v216_v21  ;;  %v219_v25 = vadd.f32 1e-05, %v217_v22 }
   0xd   :  { %299 = vrcp.f32 %v218_v23  ;;  %vm225_vm1 = vweird.f32 %v218_v23  ;;  %v231_v36 = vand.u32 2147483648, %v218_v23  ;;  %v229_v39 = vand.u32 2147483647, %v218_v23 }
   0xe   :  { %301 = vrcp.f32 %v219_v25  ;;  %v245_v40 = vand.u32 2147483648, %v219_v25  ;;  %vm239_vm3 = vweird.f32 %v219_v25  ;;  %v243_v42 = vand.u32 2147483647, %v219_v25 }
   0xf   :  { %v232_v44 = vor.u32 1.1754944e-38, %v231_v36  ;;  %vm230_vm6 = vcmp.eq.f32.partialorder %v229_v39, 8.507059e+37 }
  0x10   :  { %v246_v48 = vor.u32 1.1754944e-38, %v245_v40  ;;  %vm244_vm8 = vcmp.eq.f32.partialorder %v243_v42, 8.507059e+37 }
  0x13   :  { %v300_v31 = vpop.eup %299 }
  0x14   :  { %v302_v32 = vpop.eup %301  ;;  %v221_v34 = vmul.f32 %v300_v31, %v218_v23  ;;  %vm226_vm2 = vweird.f32 %v300_v31 }
  0x15   :  { %v235_v37 = vmul.f32 %v302_v32, %v219_v25  ;;  %vm240_vm4 = vweird.f32 %v302_v32  ;;  %vm227_vm5 = vmor %vm225_vm1, %vm226_vm2 }
  0x16   :  { %v222_v38 = vsub.f32 1.0, %v221_v34  ;;  %vm241_vm7 = vmor %vm239_vm3, %vm240_vm4 }
  0x17   :  { %v236_v41 = vsub.f32 1.0, %v235_v37 }
  0x18   :  { %v223_v43 = vmul.f32 %v300_v31, %v222_v38 }
  0x19   :  { %v237_v45 = vmul.f32 %v302_v32, %v236_v41 }
  0x1a   :  { %v224_v47 = vadd.f32 %v300_v31, %v223_v43 }
  0x1b   :  { %v238_v50 = vadd.f32 %v302_v32, %v237_v45 }
  0x1c   :  { %v228_v51 = vsel %vm227_vm5, %v300_v31, %v224_v47 }
  0x1d   :  { %v233_v52 = vsel %vm230_vm6, %v232_v44, %v228_v51  ;;  %v242_v53 = vsel %vm241_vm7, %v302_v32, %v238_v50 }
  0x1e   :  { %v247_v54 = vsel %vm244_vm8, %v246_v48, %v242_v53  ;;  %v248_v55 = vmul.f32 %v233_v52, %v214_v46 }
  0x1f   :  { %v249_v56 = vmul.f32 %v247_v54, %v215_v49 }
  0x20   :  { %v252_v57 = vsel %vm251_vm9, %v248_v55, 0.0 }
  0x21   :  { %v253_v58 = vsel %vm251_vm9, %v249_v56, 0.0 }
  0x22   :  { %v254_v59 = vadd.f32 %v253_v58, %v252_v57 }
  0x24   :  { %v255_v60 = vrot.slane %v254_v59, 4 }
  0x26   :  { %v256_v61 = vadd.f32 %v255_v60, %v254_v59 }
  0x28   :  { %v257_v62 = vrot.slane %v256_v61, 2 }
  0x2a   :  { %v258_v63 = vadd.f32 %v257_v62, %v256_v61 }
  0x2c   :  { %v259_v0 = vrot.slane %v258_v63, 1 }
  0x2e   :  { %v260_v2 = vadd.f32 %v259_v0, %v258_v63 }
  0x30   :  { %v261_v3 = vadd.f32 %v260_v2, %v250_v1 }
  0x32   :  { %263 = vst.msk [vmem:[%s378_s5] sm:$0x1] %vm184_vm0, %v261_v3 }

</bundles_post_ra>
